<compile_context>
chip_gen: v7x
topology: tpu7x:2x2x1
jax: 0.10.0
libtpu: 0.0.40
codegen_flags: <defaults>
</compile_context>

<pallas_src>
import jax
import jax.numpy as jnp
from jax.experimental import pallas as pl
from jax.experimental.pallas import tpu as pltpu


# --------------------------------------------------------------------------- #
# Kernel                                                                      #
# --------------------------------------------------------------------------- #
def _risk_kernel(x_ref, w1_ref, b1_ref, w2_ref, b2_ref, w3_ref, b3_ref, out_ref):
    """One batch tile: (TB, 48) f32 -> (TB, 8) f32. Weights stay VMEM-resident."""
    # Cast under the DMA shadow; MXU runs bf16 x bf16 -> f32 accumulation.
    x = x_ref[...].astype(jnp.bfloat16)                                 # (TB, 48)

    # --- Linear(48, 64) + ReLU ---
    h1 = jnp.dot(x, w1_ref[...], preferred_element_type=jnp.float32)   # (TB, 64)
    h1 = jnp.maximum(h1 + b1_ref[...], 0.0)

    # --- Dropout: identity (eval); BatchNorm folded into w2/b2 host-side ---

    # --- Linear(64, 32) + ReLU ---
    h2 = jnp.dot(h1.astype(jnp.bfloat16), w2_ref[...],
                 preferred_element_type=jnp.float32)                   # (TB, 32)
    h2 = jnp.maximum(h2 + b2_ref[...], 0.0)

    # --- Linear(32, 8) ---
    out = jnp.dot(h2.astype(jnp.bfloat16), w3_ref[...],
                  preferred_element_type=jnp.float32)                  # (TB, 8)
    out_ref[...] = (out + b3_ref[...]).astype(out_ref.dtype)


# --------------------------------------------------------------------------- #
# Host-side helpers                                                           #
# --------------------------------------------------------------------------- #
def _cdiv(a, b):
    return -(-a // b)


def _round_up(n, m):
    return ((n + m - 1) // m) * m


def _resident_spec(shape):
    """Full-array 2-D block that stays pinned in VMEM for every grid step."""
    return pl.BlockSpec(shape, lambda i: (0, 0))


def _choose_tile(batch, tb):
    """Adaptive batch tile (multiple of 16) and grid size; even step count
    when >1 so megacore/v7x 'parallel' sharding stays balanced."""
    tb = max(16, (tb // 16) * 16)
    if batch <= tb:
        return batch, 1                 # single whole-array block
    num_tiles = _cdiv(batch, tb)
    if num_tiles % 2:
        num_tiles += 1                  # keep TC load balance on v7x
    tile = _round_up(_cdiv(batch, num_tiles), 16)
    return tile, _cdiv(batch, tile)


def prepare_params(params):
    """One-time, per-model host prep: fold BN into Linear2, cast weights to bf16.

    Call once and reuse — keeps every inference call a single pallas_call.
    """
    w2_folded = params["bn_scale"].reshape(-1, 1) * params["w2"]        # (64, 32)
    b2_folded = params["b2"] + params["bn_shift"] @ params["w2"]        # (1, 32)
    return dict(
        w1=params["w1"].astype(jnp.bfloat16), b1=params["b1"].astype(jnp.float32),
        w2=w2_folded.astype(jnp.bfloat16),    b2=b2_folded.astype(jnp.float32),
        w3=params["w3"].astype(jnp.bfloat16), b3=params["b3"].astype(jnp.float32),
    )


def risk_assessment_forward(x, prep, *, tb=2048):
    """Pallas path. x: (B, 48) float32. prep: output of prepare_params.
    Returns (B, 8) float32."""
    B, D = x.shape
    w1, b1 = prep["w1"], prep["b1"]
    w2, b2 = prep["w2"], prep["b2"]
    w3, b3 = prep["w3"], prep["b3"]
    h1_dim, h2_dim, out_dim = w1.shape[1], w2.shape[1], w3.shape[1]

    TB, grid = _choose_tile(B, tb)

    flops = 2 * B * (D * h1_dim + h1_dim * h2_dim + h2_dim * out_dim)
    weight_bytes = sum(int(a.size) * a.dtype.itemsize
                       for a in (w1, b1, w2, b2, w3, b3))
    bytes_accessed = B * D * 4 + B * out_dim * 4 + weight_bytes

    return pl.pallas_call(
        _risk_kernel,
        out_shape=jax.ShapeDtypeStruct((B, out_dim), jnp.float32),
        grid=(grid,),
        in_specs=[
            pl.BlockSpec((TB, D), lambda i: (i, 0)),   # x streamed over batch
            _resident_spec(w1.shape), _resident_spec(b1.shape),
            _resident_spec(w2.shape), _resident_spec(b2.shape),
            _resident_spec(w3.shape), _resident_spec(b3.shape),
        ],
        out_specs=pl.BlockSpec((TB, out_dim), lambda i: (i, 0)),
        compiler_params=pltpu.CompilerParams(
            dimension_semantics=("parallel",)),
        cost_estimate=pl.CostEstimate(
            flops=flops, transcendentals=0, bytes_accessed=bytes_accessed),
    )(x, w1, b1, w2, b2, w3, b3)


@jax.jit
def risk_assessment_small(x, prep):
    """Small-batch fast path: fully fused by XLA, no Pallas launch overhead."""
    h1 = jnp.maximum(x @ prep["w1"].astype(jnp.float32) + prep["b1"], 0.0)
    h2 = jnp.maximum(h1 @ prep["w2"].astype(jnp.float32) + prep["b2"], 0.0)
    return h2 @ prep["w3"].astype(jnp.float32) + prep["b3"]


def risk_assessment(x, prep, *, tb=2048, small_batch_threshold=128):
    """Dispatcher: fused XLA path for tiny batches, Pallas kernel otherwise."""
    if x.shape[0] <= small_batch_threshold:
        return risk_assessment_small(x, prep)
    return risk_assessment_forward(x, prep, tb=tb)


# --------------------------------------------------------------------------- #
# Parameter init + pure-JAX reference                                         #
# --------------------------------------------------------------------------- #
def init_params(key, input_dim=48):
    """Deterministic synthetic parameters matching the PyTorch module's shapes."""
    ks = jax.random.split(key, 6)
    eps = 1e-5

    def lin(kw, kb, fan_in, fan_out):
        # Uniform(-1/sqrt(fan_in), 1/sqrt(fan_in)) like torch.nn.Linear default.
        bound = 1.0 / jnp.sqrt(jnp.float32(fan_in))
        w = jax.random.uniform(kw, (fan_in, fan_out), jnp.float32, -bound, bound)
        b = jax.random.uniform(kb, (1, fan_out), jnp.float32, -bound, bound)
        return w, b

    w1, b1 = lin(ks[0], ks[1], input_dim, 64)
    w2, b2 = lin(ks[2], ks[3], 64, 32)
    w3, b3 = lin(ks[4], ks[5], 32, 8)

    # BatchNorm1d(64) defaults: gamma=1, beta=0, running_mean=0, running_var=1.
    gamma = jnp.ones((1, 64), jnp.float32)
    beta = jnp.zeros((1, 64), jnp.float32)
    running_mean = jnp.zeros((1, 64), jnp.float32)
    running_var = jnp.ones((1, 64), jnp.float32)
    inv_std = 1.0 / jnp.sqrt(running_var + eps)
    bn_scale = gamma * inv_std
    bn_shift = beta - gamma * running_mean * inv_std

    return dict(w1=w1, b1=b1, w2=w2, b2=b2, w3=w3, b3=b3,
                bn_scale=bn_scale, bn_shift=bn_shift)


def reference_forward(x, p):
    """Pure-JAX f32 reference of the eval-mode PyTorch forward."""
    h1 = jnp.maximum(x @ p["w1"] + p["b1"], 0.0)
    h1 = h1 * p["bn_scale"] + p["bn_shift"]
    h2 = jnp.maximum(h1 @ p["w2"] + p["b2"], 0.0)
    return h2 @ p["w3"] + p["b3"]


# --------------------------------------------------------------------------- #
# Self-test                                                                   #
# --------------------------------------------------------------------------- #
if __name__ == "__main__":
    key = jax.random.PRNGKey(0)
    k_x, k_x2, k_p = jax.random.split(key, 3)

    batch, input_dim = 2, 48
    params = init_params(k_p, input_dim)
    prep = prepare_params(params)

    # Small batch: exercise the Pallas kernel directly (single whole-array block).
    x_small = jax.random.normal(k_x, (batch, input_dim), jnp.float32)
    out_small = jax.block_until_ready(risk_assessment_forward(x_small, prep))
    ref_small = reference_forward(x_small, params)
    assert out_small.shape == (batch, 8)
    assert jnp.allclose(out_small, ref_small, atol=3e-2, rtol=3e-2), \
        "small-batch Pallas mismatch vs JAX reference"

    # Dispatcher fast path (fused XLA) also matches.
    out_fast = jax.block_until_ready(risk_assessment(x_small, prep))
    assert jnp.allclose(out_fast, ref_small, atol=3e-2, rtol=3e-2), \
        "fast-path mismatch vs JAX reference"

    # Larger batch exercising the multi-step grid + ragged last block
    # (B=1000, tb=256 -> TB=256, grid=4, last tile has 232 valid rows).
    x_big = jax.random.normal(k_x2, (1000, input_dim), jnp.float32)
    out_big = jax.block_until_ready(risk_assessment_forward(x_big, prep, tb=256))
    ref_big = reference_forward(x_big, params)
    assert out_big.shape == (1000, 8)
    assert jnp.allclose(out_big, ref_big, atol=3e-2, rtol=3e-2), \
        "tiled-batch Pallas mismatch vs JAX reference"

    print("KERNEL_OK")
</pallas_src>

<mosaic_0001>
module attributes {stable_mosaic.version = 11 : i64} {
  func.func @_risk_kernel(%arg0: i32, %arg1: memref<2x48xf32, #tpu.memory_space<vmem>>, %arg2: memref<48x64xbf16, #tpu.memory_space<vmem>>, %arg3: memref<1x64xf32, #tpu.memory_space<vmem>>, %arg4: memref<64x32xbf16, #tpu.memory_space<vmem>>, %arg5: memref<1x32xf32, #tpu.memory_space<vmem>>, %arg6: memref<32x8xbf16, #tpu.memory_space<vmem>>, %arg7: memref<1x8xf32, #tpu.memory_space<vmem>>, %arg8: memref<2x8xf32, #tpu.memory_space<vmem>>) attributes {dimension_semantics = [#tpu.dimension_semantics<parallel>], iteration_bounds = array<i64: 1>, scalar_prefetch = 0 : i64, scratch_operands = 0 : i64, tpu.core_type = #tpu.core_type<tc>, window_params = [{transform_indices = @transform_0, window_bounds = array<i64: 2, 48>}, {pipeline_mode = #tpu.pipeline_mode<synchronous>, transform_indices = @transform_1, window_bounds = array<i64: 48, 64>}, {pipeline_mode = #tpu.pipeline_mode<synchronous>, transform_indices = @transform_2, window_bounds = array<i64: 1, 64>}, {pipeline_mode = #tpu.pipeline_mode<synchronous>, transform_indices = @transform_3, window_bounds = array<i64: 64, 32>}, {pipeline_mode = #tpu.pipeline_mode<synchronous>, transform_indices = @transform_4, window_bounds = array<i64: 1, 32>}, {pipeline_mode = #tpu.pipeline_mode<synchronous>, transform_indices = @transform_5, window_bounds = array<i64: 32, 8>}, {pipeline_mode = #tpu.pipeline_mode<synchronous>, transform_indices = @transform_6, window_bounds = array<i64: 1, 8>}, {transform_indices = @transform_7, window_bounds = array<i64: 2, 8>}]} {
    %c0 = arith.constant 0 : index
    %c0_0 = arith.constant 0 : index
    %0 = vector.load %arg1[%c0, %c0_0] : memref<2x48xf32, #tpu.memory_space<vmem>>, vector<2x48xf32>
    %1 = arith.truncf %0 : vector<2x48xf32> to vector<2x48xbf16>
    %c0_1 = arith.constant 0 : index
    %c0_2 = arith.constant 0 : index
    %2 = vector.load %arg2[%c0_1, %c0_2] : memref<48x64xbf16, #tpu.memory_space<vmem>>, vector<48x64xbf16>
    %cst = arith.constant dense<0.000000e+00> : vector<2x64xf32>
    %3 = tpu.matmul %1, %2, %cst {dimension_numbers = #tpu.dot_dimension_numbers<[1], [0], [0], [1], [0, 0, 1, 1], [], []>} : vector<2x48xbf16>, vector<48x64xbf16>, vector<2x64xf32> -> vector<2x64xf32>
    %c0_3 = arith.constant 0 : index
    %c0_4 = arith.constant 0 : index
    %4 = vector.load %arg3[%c0_3, %c0_4] : memref<1x64xf32, #tpu.memory_space<vmem>>, vector<1x64xf32>
    %5 = vector.broadcast %4 : vector<1x64xf32> to vector<2x64xf32>
    %6 = arith.addf %3, %5 : vector<2x64xf32>
    %cst_5 = arith.constant 0.000000e+00 : f32
    %7 = vector.broadcast %cst_5 : f32 to vector<2x64xf32>
    %8 = arith.maximumf %6, %7 : vector<2x64xf32>
    %9 = arith.truncf %8 : vector<2x64xf32> to vector<2x64xbf16>
    %c0_6 = arith.constant 0 : index
    %c0_7 = arith.constant 0 : index
    %10 = vector.load %arg4[%c0_6, %c0_7] : memref<64x32xbf16, #tpu.memory_space<vmem>>, vector<64x32xbf16>
    %cst_8 = arith.constant dense<0.000000e+00> : vector<2x32xf32>
    %11 = tpu.matmul %9, %10, %cst_8 {dimension_numbers = #tpu.dot_dimension_numbers<[1], [0], [0], [1], [0, 0, 1, 1], [], []>} : vector<2x64xbf16>, vector<64x32xbf16>, vector<2x32xf32> -> vector<2x32xf32>
    %c0_9 = arith.constant 0 : index
    %c0_10 = arith.constant 0 : index
    %12 = vector.load %arg5[%c0_9, %c0_10] : memref<1x32xf32, #tpu.memory_space<vmem>>, vector<1x32xf32>
    %13 = vector.broadcast %12 : vector<1x32xf32> to vector<2x32xf32>
    %14 = arith.addf %11, %13 : vector<2x32xf32>
    %cst_11 = arith.constant 0.000000e+00 : f32
    %15 = vector.broadcast %cst_11 : f32 to vector<2x32xf32>
    %16 = arith.maximumf %14, %15 : vector<2x32xf32>
    %17 = arith.truncf %16 : vector<2x32xf32> to vector<2x32xbf16>
    %c0_12 = arith.constant 0 : index
    %c0_13 = arith.constant 0 : index
    %18 = vector.load %arg6[%c0_12, %c0_13] : memref<32x8xbf16, #tpu.memory_space<vmem>>, vector<32x8xbf16>
    %cst_14 = arith.constant dense<0.000000e+00> : vector<2x8xf32>
    %19 = tpu.matmul %17, %18, %cst_14 {dimension_numbers = #tpu.dot_dimension_numbers<[1], [0], [0], [1], [0, 0, 1, 1], [], []>} : vector<2x32xbf16>, vector<32x8xbf16>, vector<2x8xf32> -> vector<2x8xf32>
    %c0_15 = arith.constant 0 : index
    %c0_16 = arith.constant 0 : index
    %20 = vector.load %arg7[%c0_15, %c0_16] : memref<1x8xf32, #tpu.memory_space<vmem>>, vector<1x8xf32>
    %21 = vector.broadcast %20 : vector<1x8xf32> to vector<2x8xf32>
    %22 = arith.addf %19, %21 : vector<2x8xf32>
    %c0_17 = arith.constant 0 : index
    %c0_18 = arith.constant 0 : index
    %23 = vector.load %arg8[%c0_17, %c0_18] : memref<2x8xf32, #tpu.memory_space<vmem>>, vector<2x8xf32>
    tpu.vector_store %arg8[%c0_17, %c0_18], %22 {strides = array<i32>} : memref<2x8xf32, #tpu.memory_space<vmem>>, vector<2x8xf32>,
    return
  }
  func.func @transform_0(%arg0: i32) -> (i32, i32) {
    %c0_i32 = arith.constant 0 : i32
    %c0_i32_0 = arith.constant 0 : i32
    return %arg0, %c0_i32 : i32, i32
  }
  func.func @transform_1(%arg0: i32) -> (i32, i32) {
    %c0_i32 = arith.constant 0 : i32
    %c0_i32_0 = arith.constant 0 : i32
    %c0_i32_1 = arith.constant 0 : i32
    return %c0_i32, %c0_i32_0 : i32, i32
  }
  func.func @transform_2(%arg0: i32) -> (i32, i32) {
    %c0_i32 = arith.constant 0 : i32
    %c0_i32_0 = arith.constant 0 : i32
    %c0_i32_1 = arith.constant 0 : i32
    return %c0_i32, %c0_i32_0 : i32, i32
  }
  func.func @transform_3(%arg0: i32) -> (i32, i32) {
    %c0_i32 = arith.constant 0 : i32
    %c0_i32_0 = arith.constant 0 : i32
    %c0_i32_1 = arith.constant 0 : i32
    return %c0_i32, %c0_i32_0 : i32, i32
  }
  func.func @transform_4(%arg0: i32) -> (i32, i32) {
    %c0_i32 = arith.constant 0 : i32
    %c0_i32_0 = arith.constant 0 : i32
    %c0_i32_1 = arith.constant 0 : i32
    return %c0_i32, %c0_i32_0 : i32, i32
  }
  func.func @transform_5(%arg0: i32) -> (i32, i32) {
    %c0_i32 = arith.constant 0 : i32
    %c0_i32_0 = arith.constant 0 : i32
    %c0_i32_1 = arith.constant 0 : i32
    return %c0_i32, %c0_i32_0 : i32, i32
  }
  func.func @transform_6(%arg0: i32) -> (i32, i32) {
    %c0_i32 = arith.constant 0 : i32
    %c0_i32_0 = arith.constant 0 : i32
    %c0_i32_1 = arith.constant 0 : i32
    return %c0_i32, %c0_i32_0 : i32, i32
  }
  func.func @transform_7(%arg0: i32) -> (i32, i32) {
    %c0_i32 = arith.constant 0 : i32
    %c0_i32_0 = arith.constant 0 : i32
    return %arg0, %c0_i32 : i32, i32
  }
}

</mosaic_0001>

<bundles_post_ra>
// kernel: tpu_custom_call.1
= control target key start
LH: loop header
LB: loop body
LE: loop exit
PB: predicated region body
PF: predicated region fallthrough
CT: control target
= control target key end

     0   :  { %v368_v1 = vmov 0.0   ;;  %vm369_vm0 = vmmov 0   ;;  %s465_s0 = inlined_call_operand.vmem [shape: f32[2,48], index: 0, kind: input, shape index: {}]   ;;  %s466_s1 = inlined_call_operand.vmem [shape: bf16[48,64], index: 1, kind: input, shape index: {}]   ;;  %s467_s2 = inlined_call_operand.vmem [shape: f32[1,64], index: 2, kind: input, shape index: {}]   ;;  %s468_s3 = inlined_call_operand.vmem [shape: bf16[64,32], index: 3, kind: input, shape index: {}]   ;;  %s469_s4 = inlined_call_operand.vmem [shape: f32[1,32], index: 4, kind: input, shape index: {}]   ;;  %s470_s5 = inlined_call_operand.vmem [shape: bf16[32,8], index: 5, kind: input, shape index: {}]   ;;  %s471_s6 = inlined_call_operand.vmem [shape: f32[1,8], index: 6, kind: input, shape index: {}]   ;;  %s472_s7 = inlined_call_operand.hbm [shape: f32[2,8], index: 7, kind: output, shape index: {}]  }
   0x1   :  { %v335_v0 = vld [vmem:[%s466_s1] sm:$0xff]   ;;  %302 = vmatprep.subr.bf16.mxu0 %v368_v1  ;;  %312 = vmatprep.subr.bf16.mxu1 %v368_v1  ;;  %v336_v2 = vld [vmem:[%s466_s1 + $0x8] sm:$0xff]   ;;  %v337_v3 = vld [vmem:[%s466_s1 + $0x10] sm:$0xff]  }
   0x2   :  { %303 = vmatpush3.bf16.msra.mxu0 %v335_v0  ;;  %308 = vmatprep.mubr.msk.bf16.mxu0 %vm369_vm0, %v368_v1  ;;  %v338_v4 = vld [vmem:[%s468_s3] sm:$0xff]   ;;  %v339_v6 = vld [vmem:[%s468_s3 + $0x8] sm:$0xff]  }
   0x3   :  { %304 = vmatprep.subr.bf16.mxu0 %v368_v1  ;;  %320 = vmatprep.mubr.msk.bf16.mxu1 %vm369_vm0, %v368_v1  ;;  %v28_v5 = vld [vmem:[%s465_s0] sm:$0x3] }
   0x4   :  { %313 = vmatpush3.bf16.msra.mxu1 %v338_v4 }
   0x5   :  { %314 = vmatprep.subr.bf16.mxu1 %v368_v1 }
   0x6   :  { %305 = vmatpush3.bf16.msra.mxu0 %v336_v2 }
   0x7   :  { %306 = vmatprep.subr.bf16.mxu0 %v368_v1 }
   0x8   :  { %12 = vsyncpa [#allocation3], 0  ;;  %v29_v7 = vpack.c.bf16 %v28_v5, %v28_v5  ;;  %vm61_vm1 = vcmask 392192   ;;  %315 = vmatpush3.bf16.msra.mxu1 %v339_v6  ;;  %v340_v8 = vld [vmem:[%s468_s3 + $0x10] sm:$0xff]   ;;  %v341_v9 = vld [vmem:[%s468_s3 + $0x18] sm:$0xff]   ;;  %vm146_vm2 = vcmask 523264  }
   0x9   :  { %316 = vmatprep.subr.bf16.mxu1 %v368_v1  ;;  %v342_v10 = vld [vmem:[%s470_s5] sm:$0xff]   ;;  %v343_v19 = vld [vmem:[%s470_s5 + $0x8] sm:$0xff]   ;;  %vm215_vm3 = vcmask 261120   ;;  %s370_s23 = smov [#allocation2]   ;;  %vm259_vm4 = vcmask 58368  }
   0xa   :  { %307 = vmatpush3.bf16.msra.mxu0 %v337_v3  ;;  %v275_v11 = vld [vmem:[%s467_s2] ss:$0 sm:$0xff]  ;;  %s267_s5 = sshll.u32 %s370_s23, 4  ;;  %s268_s5 = int_to_ptr.vmem [resolvable:$true] %s267_s5 }
   0xb   :  { %324 = vmatprep.subr.bf16.mxu0 %v368_v1  ;;  %v280_v20 = vld [vmem:[%s469_s4] ss:$0 sm:$0xff]  ;;  %s344_s4 = scalar_lea.vmem %s268_s5, 32  ;;  %p349_p1 = scmp.lt.s32.totalorder %s268_s5, %s268_s5 }
   0xc   :  { %317 = vmatpush3.bf16.msra.mxu1 %v340_v8  ;;  %v286_v28 = vld [vmem:[%s471_s6] ss:$0 sm:$0xff]  ;;  %p345_p0 = scmp.ne.s32.totalorder %s268_s5, %s344_s4  ;;  %p350_p2 = scmp.lt.s32.totalorder %s344_s4, %s344_s4 }
   0xd   :  { %309 = vmatmul.mubr.msk.bf16.vlgmr.msra.gmra.mrb[0].mxu0 %vm61_vm1, %v29_v7  ;;  %318 = vmatprep.subr.bf16.mxu1 %v368_v1 }
   0xe   :  { %328 = vmatprep.mubr.msk.bf16.mxu0 %vm369_vm0, %v368_v1  ;;  %325 = vmatpush3.bf16.msra.mxu0 %v342_v10  ;;  %p351_p3 = por %p350_p2, %p349_p1 }
   0xf   :  { %326 = vmatprep.subr.bf16.mxu0 %v368_v1 }
  0x10   :  { %319 = vmatpush3.bf16.msra.mxu1 %v341_v9  ;;  %p352_p4 = pnand %p351_p3, %p345_p0 }
  0x12   :  { %327 = vmatpush3.bf16.msra.mxu0 %v343_v19 }
  0xe0   :  { %v99_v12 = vpop.f32.mrb[0].mxu0 }
  0xe1   :  { %v100_v13 = vadd.f32 %v275_v11, %v99_v12  ;;  %v310_v14 = vpop.f32.mrb[1].mxu0 }
  0xe2   :  { %v102_v15 = vpop.f32.mrb[2].mxu0 }
  0xe3   :  { %v105_v16 = vmax.f32 %v100_v13, 0.0  ;;  %v311_v17 = vpop.f32.mrb[3].mxu0 }
  0xe5   :  { %v106_v18 = vpack.c.bf16 %v105_v16, %v105_v16 }
  0xe7   :  { %321 = vmatmul.mubr.msk.bf16.vlgmr.msra.gmra.mrb[0].mxu1 %vm146_vm2, %v106_v18 }
 0x1ba   :  { %v184_v21 = vpop.f32.mrb[0].mxu1 }
 0x1bb   :  { %v185_v22 = vadd.f32 %v280_v20, %v184_v21  ;;  %v322_v23 = vpop.f32.mrb[1].mxu1 }
 0x1bc   :  { %v187_v24 = vpop.f32.mrb[2].mxu1 }
 0x1bd   :  { %v190_v25 = vmax.f32 %v185_v22, 0.0  ;;  %v323_v26 = vpop.f32.mrb[3].mxu1 }
 0x1bf   :  { %v191_v27 = vpack.c.bf16 %v190_v25, %v190_v25 }
 0x1c1   :  { %329 = vmatmul.mubr.msk.bf16.vlgmr.msra.gmra.mrb[4].mxu0 %vm215_vm3, %v191_v27 }
 0x294   :  { %v253_v29 = vpop.f32.mrb[4].mxu0 }
 0x295   :  { %v254_v30 = vadd.f32 %v286_v28, %v253_v29  ;;  %v330_v31 = vpop.f32.mrb[5].mxu0 }
 0x296   :  { %v256_v32 = vpop.f32.mrb[6].mxu0 }
 0x297   :  { %v331_v33 = vpop.f32.mrb[7].mxu0  ;;  %260 = vst.msk [vmem:[#allocation2] sm:$0x3] %vm259_vm4, %v254_v30 }
 0x298   :  { %355 = shalt.err (!%p352_p4)
}
 0x299   :  { %s356_s6 = scalar_lea.hbm %s472_s7, 32 }
 0x29a   :  { %p357_p5 = scmp.ne.s32.totalorder %s472_s7, %s356_s6  ;;  %p360_p6 = scmp.lt.u32.totalorder %s356_s6, %s472_s7 }
 0x29c   :  { %p362_p7 = pnand %p360_p6, %p357_p5 }
 0x29e   :  { %365 = shalt.err (!%p362_p7)
}
 0x29f   :  { %270 = dma.vmem_to_hbm [thread:$0]  %s268_s5, 32, %s472_s7, [#allocation3]  }
 0x2a0   :  { %366 = dma.done.wait [#allocation3], 32  }
 0x2a1   :  { %367 = vsyncadd [#allocation3], 4294967264 }
 0x2a2   :  { %274 = vsyncpa [#allocation3], 1 }

</bundles_post_ra>
